<compile_context>
chip_gen: v6e
topology: v6e:2x2x1
jax: 0.10.0
libtpu: 0.0.40
codegen_flags: <defaults>
</compile_context>

<pallas_src>
import jax
import jax.numpy as jnp
from jax.experimental import pallas as pl
from jax.experimental.pallas import tpu as pltpu

HIDDEN = 64       # logical hidden width (matches nn.Linear(..., 64))
HIDDEN_PAD = 128  # lane-dense padded hidden width
OUT_PAD = 128     # lane-dense padded action width


def _round_up(n, m):
    return ((n + m - 1) // m) * m


def qnetwork_kernel(x_ref, w1_ref, b1_ref, w2_ref, b2_ref, w3_ref, b3_ref, o_ref):
    """Fused MLP on one batch tile. bf16 matmul inputs, f32 accumulation."""
    x = x_ref[...].astype(jnp.bfloat16)

    h1 = jnp.dot(x, w1_ref[...], preferred_element_type=jnp.float32) + b1_ref[...]
    h1 = jnp.maximum(h1, 0.0).astype(jnp.bfloat16)

    h2 = jnp.dot(h1, w2_ref[...], preferred_element_type=jnp.float32) + b2_ref[...]
    h2 = jnp.maximum(h2, 0.0).astype(jnp.bfloat16)

    q = jnp.dot(h2, w3_ref[...], preferred_element_type=jnp.float32) + b3_ref[...]
    o_ref[...] = q.astype(o_ref.dtype)


def qnetwork_forward(x, params, *, block_b=512):
    """x: [B, state_size] float32. params: dict of w1,b1,w2,b2,w3,b3 ([in,out] / [1,out])."""
    B, state_size = x.shape
    action_size = params["w3"].shape[1]

    # --- pad weights/biases to lane-dense widths; bf16 for matmul operands --
    w1 = jnp.zeros((state_size, HIDDEN_PAD), jnp.float32).at[:, :HIDDEN].set(params["w1"])
    b1 = jnp.zeros((1, HIDDEN_PAD), jnp.float32).at[:, :HIDDEN].set(params["b1"])
    w2 = jnp.zeros((HIDDEN_PAD, HIDDEN_PAD), jnp.float32).at[:HIDDEN, :HIDDEN].set(params["w2"])
    b2 = jnp.zeros((1, HIDDEN_PAD), jnp.float32).at[:, :HIDDEN].set(params["b2"])
    w3 = jnp.zeros((HIDDEN_PAD, OUT_PAD), jnp.float32).at[:HIDDEN, :action_size].set(params["w3"])
    b3 = jnp.zeros((1, OUT_PAD), jnp.float32).at[:, :action_size].set(params["b3"])
    w1 = w1.astype(jnp.bfloat16)
    w2 = w2.astype(jnp.bfloat16)
    w3 = w3.astype(jnp.bfloat16)

    # --- batch tiling: TB rows per grid step (sized well within v7x VMEM) ---
    tb = min(block_b, _round_up(B, 8))
    b_pad = _round_up(B, tb)
    if b_pad != B:
        x = jnp.pad(x, ((0, b_pad - B), (0, 0)))
    grid = (b_pad // tb,)

    # weights/biases resident in VMEM across the grid (index_map -> block 0)
    resident = lambda a: pl.BlockSpec(a.shape, lambda i: (0,) * a.ndim)

    out = pl.pallas_call(
        qnetwork_kernel,
        out_shape=jax.ShapeDtypeStruct((b_pad, OUT_PAD), jnp.float32),
        grid=grid,
        in_specs=[
            pl.BlockSpec((tb, state_size), lambda i: (i, 0)),  # x: tiled over batch
            resident(w1), resident(b1),
            resident(w2), resident(b2),
            resident(w3), resident(b3),
        ],
        out_specs=pl.BlockSpec((tb, OUT_PAD), lambda i: (i, 0)),
        compiler_params=pltpu.CompilerParams(
            dimension_semantics=("parallel",)),  # megacore sharding on v7x
    )(x, w1, b1, w2, b2, w3, b3)

    return out[:B, :action_size]


def init_qnetwork_params(key, state_size, action_size):
    """Match nn.Linear default init: U(-1/sqrt(fan_in), +1/sqrt(fan_in)); stored [in, out]."""
    def linear(key, fan_in, fan_out):
        kw, kb = jax.random.split(key)
        bound = 1.0 / jnp.sqrt(fan_in)
        w = jax.random.uniform(kw, (fan_in, fan_out), jnp.float32, -bound, bound)
        b = jax.random.uniform(kb, (1, fan_out), jnp.float32, -bound, bound)
        return w, b

    k1, k2, k3 = jax.random.split(key, 3)
    w1, b1 = linear(k1, state_size, HIDDEN)
    w2, b2 = linear(k2, HIDDEN, HIDDEN)
    w3, b3 = linear(k3, HIDDEN, action_size)
    return {"w1": w1, "b1": b1, "w2": w2, "b2": b2, "w3": w3, "b3": b3}


def reference_forward_f32(x, p):
    h1 = jnp.maximum(x @ p["w1"] + p["b1"], 0.0)
    h2 = jnp.maximum(h1 @ p["w2"] + p["b2"], 0.0)
    return h2 @ p["w3"] + p["b3"]


def reference_forward_bf16(x, p):
    """Mirrors the kernel's precision (bf16 matmul inputs, f32 accumulation)."""
    bf = jnp.bfloat16
    h1 = jnp.dot(x.astype(bf), p["w1"].astype(bf), preferred_element_type=jnp.float32) + p["b1"]
    h1 = jnp.maximum(h1, 0.0).astype(bf)
    h2 = jnp.dot(h1, p["w2"].astype(bf), preferred_element_type=jnp.float32) + p["b2"]
    h2 = jnp.maximum(h2, 0.0).astype(bf)
    return jnp.dot(h2, p["w3"].astype(bf), preferred_element_type=jnp.float32) + p["b3"]


if __name__ == "__main__":
    key = jax.random.PRNGKey(0)
    k_params, k_x = jax.random.split(key)

    batch = 2
    state_size = 8
    action_size = 4

    params = init_qnetwork_params(k_params, state_size, action_size)
    x = jax.random.normal(k_x, (batch, state_size), jnp.float32)

    out = qnetwork_forward(x, params)
    out = jax.block_until_ready(out)
    assert out.shape == (batch, action_size)

    # Tight check against a reference with the same bf16/f32 precision path.
    ref_bf16 = reference_forward_bf16(x, params)
    assert jnp.allclose(out, ref_bf16, atol=1e-3, rtol=1e-3), "mismatch vs bf16 reference"

    # Loose sanity check against the pure-f32 reference (bf16 rounding noise).
    ref_f32 = reference_forward_f32(x, params)
    assert jnp.allclose(out, ref_f32, atol=5e-2, rtol=5e-2), "mismatch vs f32 reference"

    print("KERNEL_OK")
</pallas_src>

<mosaic_0001>
module attributes {stable_mosaic.version = 11 : i64} {
  func.func @qnetwork_kernel(%arg0: i32, %arg1: memref<8x8xf32, #tpu.memory_space<vmem>>, %arg2: memref<8x128xbf16, #tpu.memory_space<vmem>>, %arg3: memref<1x128xf32, #tpu.memory_space<vmem>>, %arg4: memref<128x128xbf16, #tpu.memory_space<vmem>>, %arg5: memref<1x128xf32, #tpu.memory_space<vmem>>, %arg6: memref<128x128xbf16, #tpu.memory_space<vmem>>, %arg7: memref<1x128xf32, #tpu.memory_space<vmem>>, %arg8: memref<8x128xf32, #tpu.memory_space<vmem>>) attributes {dimension_semantics = [#tpu.dimension_semantics<parallel>], iteration_bounds = array<i64: 1>, scalar_prefetch = 0 : i64, scratch_operands = 0 : i64, tpu.core_type = #tpu.core_type<tc>, window_params = [{transform_indices = @transform_0, window_bounds = array<i64: 8, 8>}, {pipeline_mode = #tpu.pipeline_mode<synchronous>, transform_indices = @transform_1, window_bounds = array<i64: 8, 128>}, {pipeline_mode = #tpu.pipeline_mode<synchronous>, transform_indices = @transform_2, window_bounds = array<i64: 1, 128>}, {pipeline_mode = #tpu.pipeline_mode<synchronous>, transform_indices = @transform_3, window_bounds = array<i64: 128, 128>}, {pipeline_mode = #tpu.pipeline_mode<synchronous>, transform_indices = @transform_4, window_bounds = array<i64: 1, 128>}, {pipeline_mode = #tpu.pipeline_mode<synchronous>, transform_indices = @transform_5, window_bounds = array<i64: 128, 128>}, {pipeline_mode = #tpu.pipeline_mode<synchronous>, transform_indices = @transform_6, window_bounds = array<i64: 1, 128>}, {transform_indices = @transform_7, window_bounds = array<i64: 8, 128>}]} {
    %c0 = arith.constant 0 : index
    %c0_0 = arith.constant 0 : index
    %0 = vector.load %arg1[%c0, %c0_0] : memref<8x8xf32, #tpu.memory_space<vmem>>, vector<8x8xf32>
    %1 = arith.truncf %0 : vector<8x8xf32> to vector<8x8xbf16>
    %c0_1 = arith.constant 0 : index
    %c0_2 = arith.constant 0 : index
    %2 = vector.load %arg2[%c0_1, %c0_2] : memref<8x128xbf16, #tpu.memory_space<vmem>>, vector<8x128xbf16>
    %cst = arith.constant dense<0.000000e+00> : vector<8x128xf32>
    %3 = tpu.matmul %1, %2, %cst {dimension_numbers = #tpu.dot_dimension_numbers<[1], [0], [0], [1], [0, 0, 1, 1], [], []>} : vector<8x8xbf16>, vector<8x128xbf16>, vector<8x128xf32> -> vector<8x128xf32>
    %c0_3 = arith.constant 0 : index
    %c0_4 = arith.constant 0 : index
    %4 = vector.load %arg3[%c0_3, %c0_4] : memref<1x128xf32, #tpu.memory_space<vmem>>, vector<1x128xf32>
    %5 = vector.broadcast %4 : vector<1x128xf32> to vector<8x128xf32>
    %6 = arith.addf %3, %5 : vector<8x128xf32>
    %cst_5 = arith.constant 0.000000e+00 : f32
    %7 = vector.broadcast %cst_5 : f32 to vector<8x128xf32>
    %8 = arith.maximumf %6, %7 : vector<8x128xf32>
    %9 = arith.truncf %8 : vector<8x128xf32> to vector<8x128xbf16>
    %c0_6 = arith.constant 0 : index
    %c0_7 = arith.constant 0 : index
    %10 = vector.load %arg4[%c0_6, %c0_7] : memref<128x128xbf16, #tpu.memory_space<vmem>>, vector<128x128xbf16>
    %cst_8 = arith.constant dense<0.000000e+00> : vector<8x128xf32>
    %11 = tpu.matmul %9, %10, %cst_8 {dimension_numbers = #tpu.dot_dimension_numbers<[1], [0], [0], [1], [0, 0, 1, 1], [], []>} : vector<8x128xbf16>, vector<128x128xbf16>, vector<8x128xf32> -> vector<8x128xf32>
    %c0_9 = arith.constant 0 : index
    %c0_10 = arith.constant 0 : index
    %12 = vector.load %arg5[%c0_9, %c0_10] : memref<1x128xf32, #tpu.memory_space<vmem>>, vector<1x128xf32>
    %13 = vector.broadcast %12 : vector<1x128xf32> to vector<8x128xf32>
    %14 = arith.addf %11, %13 : vector<8x128xf32>
    %cst_11 = arith.constant 0.000000e+00 : f32
    %15 = vector.broadcast %cst_11 : f32 to vector<8x128xf32>
    %16 = arith.maximumf %14, %15 : vector<8x128xf32>
    %17 = arith.truncf %16 : vector<8x128xf32> to vector<8x128xbf16>
    %c0_12 = arith.constant 0 : index
    %c0_13 = arith.constant 0 : index
    %18 = vector.load %arg6[%c0_12, %c0_13] : memref<128x128xbf16, #tpu.memory_space<vmem>>, vector<128x128xbf16>
    %cst_14 = arith.constant dense<0.000000e+00> : vector<8x128xf32>
    %19 = tpu.matmul %17, %18, %cst_14 {dimension_numbers = #tpu.dot_dimension_numbers<[1], [0], [0], [1], [0, 0, 1, 1], [], []>} : vector<8x128xbf16>, vector<128x128xbf16>, vector<8x128xf32> -> vector<8x128xf32>
    %c0_15 = arith.constant 0 : index
    %c0_16 = arith.constant 0 : index
    %20 = vector.load %arg7[%c0_15, %c0_16] : memref<1x128xf32, #tpu.memory_space<vmem>>, vector<1x128xf32>
    %21 = vector.broadcast %20 : vector<1x128xf32> to vector<8x128xf32>
    %22 = arith.addf %19, %21 : vector<8x128xf32>
    %c0_17 = arith.constant 0 : index
    %c0_18 = arith.constant 0 : index
    %23 = vector.load %arg8[%c0_17, %c0_18] : memref<8x128xf32, #tpu.memory_space<vmem>>, vector<8x128xf32>
    tpu.vector_store %arg8[%c0_17, %c0_18], %22 {strides = array<i32>} : memref<8x128xf32, #tpu.memory_space<vmem>>, vector<8x128xf32>,
    return
  }
  func.func @transform_0(%arg0: i32) -> (i32, i32) {
    %c0_i32 = arith.constant 0 : i32
    %c0_i32_0 = arith.constant 0 : i32
    return %arg0, %c0_i32 : i32, i32
  }
  func.func @transform_1(%arg0: i32) -> (i32, i32) {
    %c0_i32 = arith.constant 0 : i32
    %c0_i32_0 = arith.constant 0 : i32
    %c0_i32_1 = arith.constant 0 : i32
    return %c0_i32, %c0_i32_0 : i32, i32
  }
  func.func @transform_2(%arg0: i32) -> (i32, i32) {
    %c0_i32 = arith.constant 0 : i32
    %c0_i32_0 = arith.constant 0 : i32
    %c0_i32_1 = arith.constant 0 : i32
    return %c0_i32, %c0_i32_0 : i32, i32
  }
  func.func @transform_3(%arg0: i32) -> (i32, i32) {
    %c0_i32 = arith.constant 0 : i32
    %c0_i32_0 = arith.constant 0 : i32
    %c0_i32_1 = arith.constant 0 : i32
    return %c0_i32, %c0_i32_0 : i32, i32
  }
  func.func @transform_4(%arg0: i32) -> (i32, i32) {
    %c0_i32 = arith.constant 0 : i32
    %c0_i32_0 = arith.constant 0 : i32
    %c0_i32_1 = arith.constant 0 : i32
    return %c0_i32, %c0_i32_0 : i32, i32
  }
  func.func @transform_5(%arg0: i32) -> (i32, i32) {
    %c0_i32 = arith.constant 0 : i32
    %c0_i32_0 = arith.constant 0 : i32
    %c0_i32_1 = arith.constant 0 : i32
    return %c0_i32, %c0_i32_0 : i32, i32
  }
  func.func @transform_6(%arg0: i32) -> (i32, i32) {
    %c0_i32 = arith.constant 0 : i32
    %c0_i32_0 = arith.constant 0 : i32
    %c0_i32_1 = arith.constant 0 : i32
    return %c0_i32, %c0_i32_0 : i32, i32
  }
  func.func @transform_7(%arg0: i32) -> (i32, i32) {
    %c0_i32 = arith.constant 0 : i32
    %c0_i32_0 = arith.constant 0 : i32
    return %arg0, %c0_i32 : i32, i32
  }
}

</mosaic_0001>

<bundles_post_ra>
// kernel: tpu_custom_call.1
= control target key start
LH: loop header
LB: loop body
LE: loop exit
PB: predicated region body
PF: predicated region fallthrough
CT: control target
= control target key end

     0   :  { %12 = vsyncpa [#allocation3], 0  ;;  %s696_s0 = inlined_call_operand.hbm [shape: f32[8,8], index: 0, kind: input, shape index: {}]   ;;  %s697_s1 = inlined_call_operand.hbm [shape: bf16[8,128], index: 1, kind: input, shape index: {}]   ;;  %s698_s2 = inlined_call_operand.vmem [shape: f32[1,128], index: 2, kind: input, shape index: {}]   ;;  %s699_s3 = inlined_call_operand.hbm [shape: bf16[128,128], index: 3, kind: input, shape index: {}]   ;;  %s700_s4 = inlined_call_operand.vmem [shape: f32[1,128], index: 4, kind: input, shape index: {}]   ;;  %s701_s5 = inlined_call_operand.hbm [shape: bf16[128,128], index: 5, kind: input, shape index: {}]   ;;  %s702_s6 = inlined_call_operand.vmem [shape: f32[1,128], index: 6, kind: input, shape index: {}]   ;;  %s703_s7 = inlined_call_operand.hbm [shape: f32[8,128], index: 7, kind: output, shape index: {}]  }
   0x1   :  { %13 = vsyncpa [#allocation6], 0 }
   0x2   :  { %14 = vsyncpa [#allocation9], 0 }
   0x3   :  { %15 = vsyncpa [#allocation4], 0  ;;  %s600_s24 = smov [#allocation5]   ;;  %s601_s26 = smov [#allocation2]  }
   0x4   :  { %s32_s25 = sshll.u32 %s600_s24, 4  ;;  %s22_s27 = sshll.u32 %s601_s26, 4  ;;  %s33_s25 = int_to_ptr.vmem [resolvable:$true] %s32_s25  ;;  %s23_s27 = int_to_ptr.vmem [resolvable:$true] %s22_s27 }
   0x5   :  { %s500_s28 = scalar_lea.vmem %s33_s25, 64  ;;  %p505_p1 = scmp.lt.s32.totalorder %s33_s25, %s33_s25 }
   0x6   :  { %p501_p0 = scmp.ne.s32.totalorder %s33_s25, %s500_s28  ;;  %p506_p2 = scmp.lt.s32.totalorder %s500_s28, %s500_s28 }
   0x8   :  { %p507_p3 = por %p506_p2, %p505_p1 }
   0xa   :  { %p508_p4 = pnand %p507_p3, %p501_p0 }
   0xc   :  { %511 = shalt.err (!%p508_p4)
}
   0xd   :  { %35 = dma.hbm_to_vmem [thread:$0]  %s697_s1, 64, %s33_s25, [#allocation6]  }
   0xe   :  { %s520_s8 = scalar_lea.vmem %s23_s27, 128  ;;  %p525_p6 = scmp.lt.s32.totalorder %s23_s27, %s23_s27 }
   0xf   :  { %p521_p5 = scmp.ne.s32.totalorder %s23_s27, %s520_s8  ;;  %p526_p7 = scmp.lt.s32.totalorder %s520_s8, %s520_s8 }
  0x11   :  { %p527_p8 = por %p526_p7, %p525_p6 }
  0x13   :  { %p528_p9 = pnand %p527_p8, %p521_p5 }
  0x15   :  { %531 = shalt.err (!%p528_p9)
}
  0x16   :  { %25 = dma.hbm_to_vmem [thread:$0]  %s696_s0, 128, %s23_s27, [#allocation3]  }
  0x17   :  { %s602_s11 = smov [#allocation7]  }
  0x18   :  { %s43_s12 = sshll.u32 %s602_s11, 4  ;;  %s44_s12 = int_to_ptr.vmem [resolvable:$true] %s43_s12 }
  0x19   :  { %s540_s13 = scalar_lea.vmem %s44_s12, 1024  ;;  %p545_p11 = scmp.lt.s32.totalorder %s44_s12, %s44_s12 }
  0x1a   :  { %p541_p10 = scmp.ne.s32.totalorder %s44_s12, %s540_s13  ;;  %p546_p12 = scmp.lt.s32.totalorder %s540_s13, %s540_s13 }
  0x1c   :  { %p547_p13 = por %p546_p12, %p545_p11 }
  0x1e   :  { %p548_p0 = pnand %p547_p13, %p541_p10 }
  0x20   :  { %551 = shalt.err (!%p548_p0)
}
  0x21   :  { %s603_s1 = smov 64   ;;  %s604_s14 = smov 4  }
  0x22   :  { %49 = dma.hbm_to_vmem [thread:$0]  %s699_s3, 1024, %s44_s12, [#allocation6], %s603_s1, %s603_s1, %s604_s14  }
  0x23   :  { %s605_s17 = smov [#allocation8]  }
  0x24   :  { %s57_s18 = sshll.u32 %s605_s17, 4  ;;  %s58_s18 = int_to_ptr.vmem [resolvable:$true] %s57_s18 }
  0x25   :  { %s560_s0 = scalar_lea.vmem %s58_s18, 1024  ;;  %p565_p2 = scmp.lt.s32.totalorder %s58_s18, %s58_s18 }
  0x26   :  { %p561_p1 = scmp.ne.s32.totalorder %s58_s18, %s560_s0  ;;  %p566_p3 = scmp.lt.s32.totalorder %s560_s0, %s560_s0 }
  0x28   :  { %p567_p4 = por %p566_p3, %p565_p2 }
  0x2a   :  { %p568_p5 = pnand %p567_p4, %p561_p1 }
  0x2c   :  { %571 = shalt.err (!%p568_p5)
}
  0x2d   :  { %63 = dma.hbm_to_vmem [thread:$0]  %s701_s5, 1024, %s58_s18, [#allocation9], %s603_s1, %s603_s1, %s604_s14  }
  0x2e   :  { %592 = dma.done.wait [#allocation3], 128  }
  0x2f   :  { %593 = vsyncadd [#allocation3], 4294967168 }
  0x30   :  { %594 = dma.done.wait [#allocation6], 1088  }
  0x31   :  { %595 = vsyncadd [#allocation6], 4294966208 }
  0x32   :  { %596 = dma.done.wait [#allocation9], 1024  }
  0x33   :  { %597 = vsyncadd [#allocation9], 4294966272  ;;  %v606_v0 = vmov 0.0   ;;  %vm607_vm0 = vmmov 0   ;;  %vm93_vm1 = vcmask 1043456   ;;  %v79_v2 = vld [vmem:[#allocation2] sm:$0xff] }
  0x34   :  { %421 = vmatprep.subr.bf16.mxu0 %v606_v0  ;;  %423 = vmatprep.mubr.msk.bf16.mxu0 %vm607_vm0, %v606_v0  ;;  %v81_v1 = vld [vmem:[#allocation5] sm:$0xf]  ;;  %v80_v4 = vpack.c.bf16 %v79_v2, %v79_v2  ;;  %vm89_vm2 = vcmask 64512   ;;  %v477_v6 = vld [vmem:[#allocation7 + $0x30] sm:$0xff]   ;;  %v478_v7 = vld [vmem:[#allocation7 + $0x28] sm:$0xff]   ;;  %s608_s24 = smov [#allocation10]  }
  0x35   :  { %427 = vmatprep.subr.bf16.mxu1 %v606_v0  ;;  %443 = vmatprep.mubr.msk.bf16.mxu1 %vm607_vm0, %v606_v0  ;;  %v95_v3 = vsel %vm93_vm1, %v81_v1, 0  ;;  %v476_v5 = vld [vmem:[#allocation7 + $0x38] sm:$0xff]   ;;  %v479_v8 = vld [vmem:[#allocation7 + $0x20] sm:$0xff]   ;;  %v481_v10 = vld [vmem:[#allocation7 + $0x10] sm:$0xff]   ;;  %s370_s25 = sshll.u32 %s608_s24, 4  ;;  %s371_s25 = int_to_ptr.vmem [resolvable:$true] %s370_s25 }
  0x36   :  { %422 = vmatpush3.bf16.msra.mxu0 %v95_v3  ;;  %428 = vmatpush3.bf16.msra.mxu1 %v476_v5  ;;  %v480_v9 = vld [vmem:[#allocation7 + $0x18] sm:$0xff]   ;;  %v482_v11 = vld [vmem:[#allocation7 + $0x8] sm:$0xff]   ;;  %v483_v12 = vld [vmem:[#allocation7] sm:$0xff]   ;;  %p577_p7 = scmp.lt.s32.totalorder %s371_s25, %s371_s25 }
  0x37   :  { %447 = vmatprep.subr.bf16.mxu0 %v606_v0  ;;  %429 = vmatprep.subr.bf16.mxu1 %v606_v0  ;;  %v484_v13 = vld [vmem:[#allocation8 + $0x38] sm:$0xff]   ;;  %v485_v14 = vld [vmem:[#allocation8 + $0x30] sm:$0xff]   ;;  %v486_v15 = vld [vmem:[#allocation8 + $0x28] sm:$0xff]  }
  0x38   :  { %v487_v16 = vld [vmem:[#allocation8 + $0x20] sm:$0xff]   ;;  %v488_v17 = vld [vmem:[#allocation8 + $0x18] sm:$0xff]   ;;  %v489_v18 = vld [vmem:[#allocation8 + $0x10] sm:$0xff]  }
  0x39   :  { %424 = vmatmul.mubr.msk.bf16.vlgmr.msra.gmra.mxu0 %vm89_vm2, %v80_v4  ;;  %v381_v19 = vld [vmem:[%s698_s2] ss:$0 sm:$0xff]  ;;  %v490_v27 = vld [vmem:[#allocation8 + $0x8] sm:$0xff]   ;;  %v491_v28 = vld [vmem:[#allocation8] sm:$0xff]  }
  0x3a   :  { %463 = vmatprep.mubr.msk.bf16.mxu0 %vm607_vm0, %v606_v0  ;;  %430 = vmatpush3.bf16.msra.mxu1 %v477_v6  ;;  %v383_v29 = vld [vmem:[%s700_s4] ss:$0 sm:$0xff]  ;;  %s572_s4 = scalar_lea.vmem %s371_s25, 128 }
  0x3b   :  { %431 = vmatprep.subr.bf16.mxu1 %v606_v0  ;;  %448 = vmatpush3.bf16.msra.mxu0 %v484_v13  ;;  %v392_v37 = vld [vmem:[%s702_s6] ss:$0 sm:$0xff]  ;;  %p573_p6 = scmp.ne.s32.totalorder %s371_s25, %s572_s4  ;;  %p578_p8 = scmp.lt.s32.totalorder %s572_s4, %s572_s4 }
  0x3c   :  { %449 = vmatprep.subr.bf16.mxu0 %v606_v0 }
  0x3d   :  { %p579_p9 = por %p578_p8, %p577_p7 }
  0x3e   :  { %432 = vmatpush3.bf16.msra.mxu1 %v478_v7 }
  0x3f   :  { %433 = vmatprep.subr.bf16.mxu1 %v606_v0  ;;  %450 = vmatpush3.bf16.msra.mxu0 %v485_v14  ;;  %p580_p10 = pnand %p579_p9, %p573_p6 }
  0x40   :  { %451 = vmatprep.subr.bf16.mxu0 %v606_v0 }
  0x42   :  { %434 = vmatpush3.bf16.msra.mxu1 %v479_v8 }
  0x43   :  { %435 = vmatprep.subr.bf16.mxu1 %v606_v0  ;;  %452 = vmatpush3.bf16.msra.mxu0 %v486_v15 }
  0x44   :  { %453 = vmatprep.subr.bf16.mxu0 %v606_v0 }
  0x46   :  { %436 = vmatpush3.bf16.msra.mxu1 %v480_v9 }
  0x47   :  { %437 = vmatprep.subr.bf16.mxu1 %v606_v0  ;;  %454 = vmatpush3.bf16.msra.mxu0 %v487_v16 }
  0x48   :  { %455 = vmatprep.subr.bf16.mxu0 %v606_v0 }
  0x4a   :  { %438 = vmatpush3.bf16.msra.mxu1 %v481_v10 }
  0x4b   :  { %439 = vmatprep.subr.bf16.mxu1 %v606_v0  ;;  %456 = vmatpush3.bf16.msra.mxu0 %v488_v17 }
  0x4c   :  { %457 = vmatprep.subr.bf16.mxu0 %v606_v0 }
  0x4e   :  { %440 = vmatpush3.bf16.msra.mxu1 %v482_v11 }
  0x4f   :  { %441 = vmatprep.subr.bf16.mxu1 %v606_v0  ;;  %458 = vmatpush3.bf16.msra.mxu0 %v489_v18 }
  0x50   :  { %459 = vmatprep.subr.bf16.mxu0 %v606_v0 }
  0x52   :  { %442 = vmatpush3.bf16.msra.mxu1 %v483_v12 }
  0x53   :  { %460 = vmatpush3.bf16.msra.mxu0 %v490_v27 }
  0x54   :  { %461 = vmatprep.subr.bf16.mxu0 %v606_v0 }
  0x57   :  { %462 = vmatpush3.bf16.msra.mxu0 %v491_v28 }
  0xf9   :  { %v131_v20 = vpop.f32.mrf.mxu0 }
  0xfa   :  { %v132_v21 = vadd.f32 %v381_v19, %v131_v20 }
  0xfb   :  { %v425_v22 = vpop.f32.mrf.mxu0 }
  0xfc   :  { %v137_v23 = vmax.f32 %v132_v21, 0.0 }
  0xfd   :  { %v134_v24 = vpop.f32.mrf.mxu0 }
  0xfe   :  { %v138_v25 = vpack.c.bf16 %v137_v23, %v137_v23 }
  0xff   :  { %v426_v26 = vpop.f32.mrf.mxu0 }
 0x100   :  { %444 = vmatmul.mubr.bf16.vlgmr.msra.gmra.mxu1 %v138_v25 }
 0x1c0   :  { %v244_v30 = vpop.f32.mrf.mxu1 }
 0x1c1   :  { %v245_v31 = vadd.f32 %v383_v29, %v244_v30 }
 0x1c2   :  { %v445_v32 = vpop.f32.mrf.mxu1 }
 0x1c3   :  { %v250_v33 = vmax.f32 %v245_v31, 0.0 }
 0x1c4   :  { %v247_v34 = vpop.f32.mrf.mxu1 }
 0x1c5   :  { %v251_v35 = vpack.c.bf16 %v250_v33, %v250_v33 }
 0x1c6   :  { %v446_v36 = vpop.f32.mrf.mxu1 }
 0x1c7   :  { %464 = vmatmul.mubr.bf16.vlgmr.msra.gmra.mxu0 %v251_v35 }
 0x287   :  { %v357_v38 = vpop.f32.mrf.mxu0 }
 0x288   :  { %v358_v39 = vadd.f32 %v392_v37, %v357_v38 }
 0x289   :  { %v465_v40 = vpop.f32.mrf.mxu0 }
 0x28a   :  { %363 = vst [vmem:[#allocation10] sm:$0xff] %v358_v39 }
 0x28b   :  { %v360_v41 = vpop.f32.mrf.mxu0 }
 0x28c   :  { %583 = shalt.err (!%p580_p10)
}
 0x28d   :  { %373 = dma.vmem_to_hbm [thread:$0]  %s371_s25, 128, %s703_s7, [#allocation4]   ;;  %v466_v42 = vpop.f32.mrf.mxu0 }
 0x28e   :  { %598 = dma.done.wait [#allocation4], 128  }
 0x28f   :  { %599 = vsyncadd [#allocation4], 4294967168 }
 0x290   :  { %377 = vsyncpa [#allocation3], 1 }
 0x291   :  { %378 = vsyncpa [#allocation6], 1 }
 0x292   :  { %379 = vsyncpa [#allocation9], 1 }
 0x293   :  { %380 = vsyncpa [#allocation4], 1 }

</bundles_post_ra>
